<compile_context>
chip_gen: v5e
topology: v5e:2x2
jax: 0.10.0
libtpu: 0.0.40
codegen_flags: <defaults>
</compile_context>

<pallas_src>
import jax
import jax.numpy as jnp
from jax.experimental import pallas as pl
from jax.experimental.pallas import tpu as pltpu


def _gradient_kernel(x_ref, o_ref):
    # x_ref block: (TB, H, W) in the input dtype ; o_ref block: (TB, H-2, W-2).
    x = x_ref[...].astype(jnp.float32)
    tb, H, W = x.shape
    Ho, Wo = H - 2, W - 2

    # Separable Sobel (cross-correlation, matches F.conv2d):
    #   s[i,j] = x[i,j] + 2*x[i+1,j] + x[i+2,j]  -> grad_x = s[:, 2:] - s[:, :-2]
    #   d[i,j] = x[i+2,j] - x[i,j]               -> grad_y = d[:, :-2] + 2*d[:, 1:-1] + d[:, 2:]
    xt = x[:, 0:Ho, :]          # rows i
    xm = x[:, 1:Ho + 1, :]      # rows i+1
    xb = x[:, 2:H, :]           # rows i+2
    s = xt + 2.0 * xm + xb      # (TB, Ho, W)
    d = xb - xt                 # (TB, Ho, W)

    gx = s[:, :, 2:W] - s[:, :, 0:Wo]
    gy = d[:, :, 0:Wo] + 2.0 * d[:, :, 1:Wo + 1] + d[:, :, 2:W]
    g = jnp.abs(gx) + jnp.abs(gy)                       # (TB, Ho, Wo)

    # Store the valid region directly at its true width; no pad columns.
    o_ref[...] = g.astype(o_ref.dtype)


def _tensorcores_per_chip():
    """Best-effort TC-per-chip query (v7x = 2); safe fallback to 1."""
    try:
        info = pltpu.get_tpu_info()
        for name in ("num_cores", "tensorcores_per_chip", "num_tensorcores",
                     "cores_per_chip"):
            v = getattr(info, name, None)
            if isinstance(v, int) and v > 0:
                return v
    except Exception:
        pass
    try:
        v = getattr(jax.devices()[0], "num_cores", None)
        if isinstance(v, int) and v > 0:
            return v
    except Exception:
        pass
    return 1


def _divisors_leq(n, cap):
    divs = set()
    i = 1
    while i * i <= n:
        if n % i == 0:
            if i <= cap:
                divs.add(i)
            if (n // i) <= cap:
                divs.add(n // i)
        i += 1
    return sorted(divs)


def _pick_batch_tile(nc, h, w, *, target_bytes=2 << 20, num_cores=1):
    """Images per block: ~2 MiB of f32 per block, tb an exact divisor of nc.

    If the chip has >1 TensorCore, prefer a tb whose block count is a multiple
    of the core count (even megacore split); single-TC chips take the largest
    divisor <= the byte target (fewest grid steps).
    """
    per_image = h * w * 4  # f32 compute footprint per image
    cap = max(1, target_bytes // per_image)
    cap = min(cap, nc)
    divs = _divisors_leq(nc, cap)          # always contains 1
    tb = divs[-1]
    if num_cores > 1:
        pref = [d for d in divs if (nc // d) % num_cores == 0]
        if pref:
            tb = pref[-1]
    return int(tb)


def gradient(x):
    """x: (N, 1, H, W) -> (N, 1, H-2, W-2), Sobel |gx| + |gy| (matches PyTorch)."""
    N, C, H, W = x.shape
    assert C == 1, "Gradient module uses a (1,1,3,3) kernel; in_channels must be 1"
    assert H >= 3 and W >= 3, "spatial dims must be >= 3 for a valid 3x3 conv"
    Ho, Wo = H - 2, W - 2
    NC = N * C

    # Keep native dtype (bf16/f32/...); the kernel upcasts to f32 internally.
    x_flat = x.reshape(NC, H, W)
    out_dtype = x.dtype if jnp.issubdtype(x.dtype, jnp.floating) else jnp.float32

    tb = _pick_batch_tile(NC, H, W, num_cores=_tensorcores_per_chip())
    num_blocks = NC // tb  # exact: tb divides NC

    out = pl.pallas_call(
        _gradient_kernel,
        out_shape=jax.ShapeDtypeStruct((NC, Ho, Wo), out_dtype),
        grid=(num_blocks,),
        in_specs=[pl.BlockSpec((tb, H, W), lambda n: (n, 0, 0))],
        out_specs=pl.BlockSpec((tb, Ho, Wo), lambda n: (n, 0, 0)),
        compiler_params=pltpu.CompilerParams(
            dimension_semantics=("parallel",),
            vmem_limit_bytes=48 * 1024 * 1024,
        ),
    )(x_flat)

    return out.reshape(N, C, Ho, Wo)


def _gradient_ref(x):
    """Pure-JAX reference (same math) for a sanity check."""
    kx = jnp.array([[-1.0, 0.0, 1.0], [-2.0, 0.0, 2.0], [-1.0, 0.0, 1.0]],
                   jnp.float32).reshape(1, 1, 3, 3)
    ky = jnp.array([[-1.0, -2.0, -1.0], [0.0, 0.0, 0.0], [1.0, 2.0, 1.0]],
                   jnp.float32).reshape(1, 1, 3, 3)
    xf = x.astype(jnp.float32)
    dn = jax.lax.conv_dimension_numbers(xf.shape, kx.shape, ("NCHW", "OIHW", "NCHW"))
    gx = jax.lax.conv_general_dilated(xf, kx, (1, 1), "VALID", dimension_numbers=dn)
    gy = jax.lax.conv_general_dilated(xf, ky, (1, 1), "VALID", dimension_numbers=dn)
    return jnp.abs(gx) + jnp.abs(gy)


if __name__ == "__main__":
    key = jax.random.PRNGKey(0)
    x = jax.random.normal(key, (4, 1, 16, 16), dtype=jnp.float32)

    out = gradient(x)
    jax.block_until_ready(out)

    ref = _gradient_ref(x)
    assert out.shape == (4, 1, 14, 14), out.shape
    assert jnp.allclose(out, ref, atol=1e-5, rtol=1e-5), float(jnp.max(jnp.abs(out - ref)))

    print("KERNEL_OK")
</pallas_src>

<mosaic_0001>
module attributes {stable_mosaic.version = 11 : i64} {
  func.func @_gradient_kernel(%arg0: i32, %arg1: memref<4x16x16xf32, #tpu.memory_space<vmem>>, %arg2: memref<4x14x14xf32, #tpu.memory_space<vmem>>) attributes {dimension_semantics = [#tpu.dimension_semantics<parallel>], iteration_bounds = array<i64: 1>, scalar_prefetch = 0 : i64, scratch_operands = 0 : i64, tpu.core_type = #tpu.core_type<tc>, window_params = [{transform_indices = @transform_0, window_bounds = array<i64: 4, 16, 16>}, {transform_indices = @transform_1, window_bounds = array<i64: 4, 14, 14>}]} {
    %c0 = arith.constant 0 : index
    %c0_0 = arith.constant 0 : index
    %c0_1 = arith.constant 0 : index
    %0 = vector.load %arg1[%c0, %c0_0, %c0_1] : memref<4x16x16xf32, #tpu.memory_space<vmem>>, vector<4x16x16xf32>
    %1 = vector.extract_strided_slice %0 {offsets = [0, 0, 0], sizes = [4, 14, 16], strides = [1, 1, 1]} : vector<4x16x16xf32> to vector<4x14x16xf32>
    %2 = vector.extract_strided_slice %0 {offsets = [0, 1, 0], sizes = [4, 14, 16], strides = [1, 1, 1]} : vector<4x16x16xf32> to vector<4x14x16xf32>
    %3 = vector.extract_strided_slice %0 {offsets = [0, 2, 0], sizes = [4, 14, 16], strides = [1, 1, 1]} : vector<4x16x16xf32> to vector<4x14x16xf32>
    %cst = arith.constant 2.000000e+00 : f32
    %4 = vector.broadcast %cst : f32 to vector<4x14x16xf32>
    %5 = arith.mulf %4, %2 : vector<4x14x16xf32>
    %6 = arith.addf %1, %5 : vector<4x14x16xf32>
    %7 = arith.addf %6, %3 : vector<4x14x16xf32>
    %8 = arith.subf %3, %1 : vector<4x14x16xf32>
    %9 = vector.extract_strided_slice %7 {offsets = [0, 0, 2], sizes = [4, 14, 14], strides = [1, 1, 1]} : vector<4x14x16xf32> to vector<4x14x14xf32>
    %10 = vector.extract_strided_slice %7 {offsets = [0, 0, 0], sizes = [4, 14, 14], strides = [1, 1, 1]} : vector<4x14x16xf32> to vector<4x14x14xf32>
    %11 = arith.subf %9, %10 : vector<4x14x14xf32>
    %12 = vector.extract_strided_slice %8 {offsets = [0, 0, 0], sizes = [4, 14, 14], strides = [1, 1, 1]} : vector<4x14x16xf32> to vector<4x14x14xf32>
    %13 = vector.extract_strided_slice %8 {offsets = [0, 0, 1], sizes = [4, 14, 14], strides = [1, 1, 1]} : vector<4x14x16xf32> to vector<4x14x14xf32>
    %cst_2 = arith.constant 2.000000e+00 : f32
    %14 = vector.broadcast %cst_2 : f32 to vector<4x14x14xf32>
    %15 = arith.mulf %14, %13 : vector<4x14x14xf32>
    %16 = arith.addf %12, %15 : vector<4x14x14xf32>
    %17 = vector.extract_strided_slice %8 {offsets = [0, 0, 2], sizes = [4, 14, 14], strides = [1, 1, 1]} : vector<4x14x16xf32> to vector<4x14x14xf32>
    %18 = arith.addf %16, %17 : vector<4x14x14xf32>
    %19 = math.absf %11 : vector<4x14x14xf32>
    %20 = math.absf %18 : vector<4x14x14xf32>
    %21 = arith.addf %19, %20 : vector<4x14x14xf32>
    %c0_3 = arith.constant 0 : index
    %c0_4 = arith.constant 0 : index
    %c0_5 = arith.constant 0 : index
    %22 = vector.load %arg2[%c0_3, %c0_4, %c0_5] : memref<4x14x14xf32, #tpu.memory_space<vmem>>, vector<4x14x14xf32>
    tpu.vector_store %arg2[%c0_3, %c0_4, %c0_5], %21 {strides = array<i32>} : memref<4x14x14xf32, #tpu.memory_space<vmem>>, vector<4x14x14xf32>,
    return
  }
  func.func @transform_0(%arg0: i32) -> (i32, i32, i32) {
    %c0_i32 = arith.constant 0 : i32
    %c0_i32_0 = arith.constant 0 : i32
    %c0_i32_1 = arith.constant 0 : i32
    return %arg0, %c0_i32, %c0_i32_0 : i32, i32, i32
  }
  func.func @transform_1(%arg0: i32) -> (i32, i32, i32) {
    %c0_i32 = arith.constant 0 : i32
    %c0_i32_0 = arith.constant 0 : i32
    %c0_i32_1 = arith.constant 0 : i32
    return %arg0, %c0_i32, %c0_i32_0 : i32, i32, i32
  }
}

</mosaic_0001>

<bundles_post_ra>
// kernel: tpu_custom_call.1
= control target key start
LH: loop header
LB: loop body
LE: loop exit
PB: predicated region body
PF: predicated region fallthrough
CT: control target
= control target key end

     0   :  { %6 = vsyncpa [#allocation3], 0  ;;  %s418_s9 = smov [#allocation2]   ;;  %s419_s11 = smov 128   ;;  %s641_s0 = inlined_call_operand.hbm [shape: f32[4,16,16], index: 0, kind: input, shape index: {}]   ;;  %s642_s1 = inlined_call_operand.vmem [shape: f32[4,14,14], index: 1, kind: output, shape index: {}]  }
   0x1   :  { %s11_s8 = sshll.u32 %s641_s0, 4  ;;  %s13_s10 = sshll.u32 %s418_s9, 4  ;;  %s12_s8 = int_to_ptr.hbm [resolvable:$true] %s11_s8  ;;  %s14_s10 = int_to_ptr.vmem [resolvable:$true] %s13_s10 }
   0x2   :  { %s420_s12 = smov 8  }
   0x3   :  { %19 = dma.hbm_to_vmem [thread:$0]  %s12_s8, 1024, %s14_s10, [#allocation3], %s419_s11, %s419_s11, %s420_s12  }
   0x4   :  { %416 = dma.done.wait [#allocation3], 1024  }
   0x5   :  { %417 = vsyncadd [#allocation3], 4294966272  ;;  %v437_v0 = vld [vmem:[#allocation2 + $0x10] sm:$0xff]  ;;  %v439_v1 = vld [vmem:[#allocation2] sm:$0xff]  ;;  %vm114_vm0 = vcmask 1041408   ;;  %s421_s0 = smov 127  }
   0x6   :  { %v441_v2 = vld [vmem:[#allocation2 + $0x18] sm:$0xff]  ;;  %v118_v3 = vrot.slane %v437_v0, 6  ;;  %v115_v4 = vrot.slane %v439_v1, 6  ;;  %v446_v6 = vld [vmem:[#allocation2 + $0x8] sm:$0xff]  ;;  %v448_v7 = vld [vmem:[#allocation2 + $0x20] sm:$0xff]  ;;  %s422_s13 = smov 126  }
   0x7   :  { %v119_v5 = vrot.slane %v441_v2, 6  ;;  %v116_v8 = vrot.slane %v446_v6, 6  ;;  %v121_v9 = vrot.slane %v448_v7, 6  ;;  %v463_v15 = vld [vmem:[#allocation2 + $0x28] sm:$0xff]  ;;  %v467_v18 = vld [vmem:[#allocation2 + $0x30] sm:$0xff]  ;;  %v469_v19 = vld [vmem:[#allocation2 + $0x38] sm:$0xff] }
   0x8   :  { %v453_v10 = vsub.f32 %v437_v0, %v118_v3  ;;  %v456_v11 = vsub.f32 %v439_v1, %v115_v4  ;;  %v122_v23 = vrot.slane %v463_v15, 6  ;;  %v124_v24 = vrot.slane %v467_v18, 6  ;;  %s423_s14 = smov 2  }
   0x9   :  { %v120_v12 = vsel %vm114_vm0, %v118_v3, %v119_v5  ;;  %v117_v13 = vsel %vm114_vm0, %v115_v4, %v116_v8  ;;  %v461_v14 = vsub.f32 %v448_v7, %v121_v9  ;;  %v125_v25 = vrot.slane %v469_v19, 6 }
   0xa   :  { %v185_v16 = vmul.f32 2.0, %v453_v10  ;;  %v183_v17 = vmul.f32 2.0, %v456_v11  ;;  %v473_v21 = vsub.f32 %v441_v2, %v120_v12  ;;  %v476_v22 = vsub.f32 %v446_v6, %v117_v13 }
   0xb   :  { %v187_v20 = vmul.f32 2.0, %v461_v14  ;;  %v123_v26 = vsel %vm114_vm0, %v121_v9, %v122_v23  ;;  %v126_v30 = vsel %vm114_vm0, %v124_v24, %v125_v25  ;;  %v493_v33 = vsub.f32 %v467_v18, %v124_v24 }
   0xc   :  { %203 = vrot.lane.b32.xlu1 %v185_v16, %s421_s0  ;;  %199 = vrot.lane.b32.xlu0 %v183_v17, %s421_s0  ;;  %v483_v27 = vsub.f32 %v463_v15, %v123_v26  ;;  %v186_v28 = vmul.f32 2.0, %v473_v21  ;;  %v184_v29 = vmul.f32 2.0, %v476_v22  ;;  %v490_v32 = vsub.f32 %v469_v19, %v126_v30 }
   0xd   :  { %207 = vrot.lane.b32.xlu2 %v187_v20, %s421_s0  ;;  %v189_v35 = vmul.f32 2.0, %v493_v33  ;;  %v34_v36 = vmul.f32 2.0, %v437_v0  ;;  %v35_v37 = vmul.f32 2.0, %v441_v2  ;;  %vm48_vm1 = vcmask 1046528  }
   0xe   :  { %v188_v31 = vmul.f32 2.0, %v483_v27  ;;  %v190_v34 = vmul.f32 2.0, %v490_v32  ;;  %v89_v41 = vrot.slane %v437_v0, 2  ;;  %v90_v42 = vrot.slane %v441_v2, 2 }
   0xf   :  { %v52_v38 = vrot.slane %v34_v36, 1  ;;  %v53_v39 = vrot.slane %v35_v37, 1  ;;  %v32_v43 = vmul.f32 2.0, %v439_v1  ;;  %vm85_vm2 = vcmask 1045504  }
  0x10   :  { %v33_v45 = vmul.f32 2.0, %v446_v6  ;;  %v91_v46 = vsel %vm85_vm2, %v89_v41, %v90_v42  ;;  %v86_v50 = vrot.slane %v439_v1, 2  ;;  %v87_v51 = vrot.slane %v446_v6, 2 }
  0x11   :  { %v54_v40 = vsel %vm48_vm1, %v52_v38, %v53_v39  ;;  %v49_v47 = vrot.slane %v32_v43, 1  ;;  %v37_v53 = vmul.f32 2.0, %v463_v15  ;;  %v93_v60 = vrot.slane %v463_v15, 2 }
  0x12   :  { %v71_v44 = vadd.f32 %v54_v40, %v437_v0  ;;  %v50_v49 = vrot.slane %v33_v45, 1  ;;  %v88_v55 = vsel %vm85_vm2, %v86_v50, %v87_v51  ;;  %v36_v63 = vmul.f32 2.0, %v448_v7 }
  0x13   :  { %v56_v56 = vrot.slane %v37_v53, 1  ;;  %v38_v13 = vmul.f32 2.0, %v467_v18  ;;  %v96_v20 = vrot.slane %v469_v19, 2  ;;  %vm373_vm3 = vcmask 111616  }
  0x14   :  { %205 = vrot.lane.b32.xlu1 %v186_v28, %s421_s0  ;;  %201 = vrot.lane.b32.xlu0 %v184_v29, %s421_s0  ;;  %v522_v48 = vadd.f32 %v91_v46, %v71_v44  ;;  %v51_v52 = vsel %vm48_vm1, %v49_v47, %v50_v49  ;;  %v70_v58 = vadd.f32 %v50_v49, %v446_v6  ;;  %v55_v3 = vrot.slane %v36_v63, 1 }
  0x15   :  { %209 = vrot.lane.b32.xlu2 %v188_v31, %s421_s0  ;;  %v69_v54 = vadd.f32 %v51_v52, %v439_v1  ;;  %v74_v59 = vadd.f32 %v56_v56, %v463_v15  ;;  %v72_v1 = vadd.f32 %v53_v39, %v441_v2  ;;  %v92_v6 = vrot.slane %v448_v7, 2 }
  0x16   :  { %v539_v61 = vadd.f32 %v87_v51, %v70_v58  ;;  %v57_v5 = vsel %vm48_vm1, %v55_v3, %v56_v56  ;;  %v39_v2 = vmul.f32 2.0, %v469_v19  ;;  %v58_v15 = vrot.slane %v38_v13, 1 }
  0x17   :  { %v532_v57 = vadd.f32 %v88_v55, %v69_v54  ;;  %v541_v62 = vadd.f32 %v93_v60, %v74_v59  ;;  %v549_v4 = vadd.f32 %v90_v42, %v72_v1  ;;  %v73_v8 = vadd.f32 %v57_v5, %v448_v7 }
  0x18   :  { %v94_v9 = vsel %vm85_vm2, %v92_v6, %v93_v60  ;;  %v59_v16 = vrot.slane %v39_v2, 1  ;;  %v95_v7 = vrot.slane %v467_v18, 2  ;;  %vm371_vm4 = vcmask 113664  }
  0x19   :  { %v557_v12 = vadd.f32 %v94_v9, %v73_v8 }
  0x1a   :  { %v60_v17 = vsel %vm48_vm1, %v58_v15, %v59_v16  ;;  %v97_v25 = vsel %vm85_vm2, %v95_v7, %v96_v20  ;;  %v76_v26 = vadd.f32 %v59_v16, %v469_v19 }
  0x1b   :  { %v75_v24 = vadd.f32 %v60_v17, %v467_v18 }
  0x1c   :  { %213 = vrot.lane.b32.xlu1 %v190_v34, %s421_s0  ;;  %211 = vrot.lane.b32.xlu0 %v189_v35, %s421_s0  ;;  %v571_v29 = vadd.f32 %v96_v20, %v76_v26 }
  0x1d   :  { %239 = vrot.lane.b32.xlu2 %v456_v11, %s422_s13  ;;  %v569_v28 = vadd.f32 %v97_v25, %v75_v24 }
  0x24   :  { %243 = vrot.lane.b32.xlu1 %v453_v10, %s422_s13  ;;  %241 = vrot.lane.b32.xlu0 %v476_v22, %s422_s13 }
  0x25   :  { %245 = vrot.lane.b32.xlu2 %v473_v21, %s422_s13 }
  0x2c   :  { %249 = vrot.lane.b32.xlu1 %v483_v27, %s422_s13  ;;  %247 = vrot.lane.b32.xlu0 %v461_v14, %s422_s13 }
  0x2d   :  { %251 = vrot.lane.b32.xlu2 %v493_v33, %s422_s13 }
  0x34   :  { %253 = vrot.lane.b32.xlu0 %v490_v32, %s422_s13  ;;  %151 = vrot.lane.b32.xlu1 %v532_v57, %s423_s14 }
  0x35   :  { %153 = vrot.lane.b32.xlu2 %v539_v61, %s423_s14 }
  0x3c   :  { %155 = vrot.lane.b32.xlu0 %v522_v48, %s423_s14  ;;  %157 = vrot.lane.b32.xlu1 %v549_v4, %s423_s14 }
  0x3d   :  { %159 = vrot.lane.b32.xlu2 %v557_v12, %s423_s14 }
  0x44   :  { %161 = vrot.lane.b32.xlu0 %v541_v62, %s423_s14  ;;  %163 = vrot.lane.b32.xlu1 %v569_v28, %s423_s14 }
  0x45   :  { %165 = vrot.lane.b32.xlu2 %v571_v29, %s423_s14 }
  0x67   :  { %v208_v0 = vpop.permute.xlu2 %207 }
  0x6f   :  { %v210_v23 = vpop.permute.xlu2 %209 }
  0x70   :  { %v228_v53 = vadd.f32 %v210_v23, %v483_v27 }
  0x77   :  { %v240_v30 = vpop.permute.xlu2 %239 }
  0x7e   :  { %v204_v31 = vpop.permute.xlu1 %203  ;;  %v200_v34 = vpop.permute.xlu0 %199 }
  0x7f   :  { %v246_v35 = vpop.permute.xlu2 %245  ;;  %v223_v42 = vadd.f32 %v200_v34, %v456_v11  ;;  %v225_v44 = vadd.f32 %v204_v31, %v453_v10  ;;  %v227_v11 = vadd.f32 %v208_v0, %v461_v14 }
  0x81   :  { %v263_v43 = vadd.f32 %v240_v30, %v223_v42 }
  0x83   :  { %v279_v49 = vand.u32 2147483647, %v263_v43 }
  0x85   :  { %v295_v54 = vrot.slane %v279_v49, 2 }
  0x86   :  { %v206_v36 = vpop.permute.xlu1 %205  ;;  %v202_v18 = vpop.permute.xlu0 %201 }
  0x87   :  { %v226_v37 = vadd.f32 %v206_v36, %v473_v21  ;;  %v224_v45 = vadd.f32 %v202_v18, %v476_v22  ;;  %v252_v1 = vpop.permute.xlu2 %251 }
  0x89   :  { %v266_v38 = vadd.f32 %v246_v35, %v226_v37 }
  0x8b   :  { %v282_v19 = vand.u32 2147483647, %v266_v38 }
  0x8d   :  { %v299_v39 = vrot.slane %v282_v19, 2 }
  0x8e   :  { %v214_v40 = vpop.permute.xlu1 %213  ;;  %v212_v41 = vpop.permute.xlu0 %211 }
  0x8f   :  { %313 = vrot.lane.b32.xlu0 %v299_v39, %s423_s14  ;;  %v229_v60 = vadd.f32 %v212_v41, %v493_v33  ;;  %v230_v8 = vadd.f32 %v214_v40, %v490_v32  ;;  %v154_v20 = vpop.permute.xlu2 %153 }
  0x90   :  { %v176_v43 = vsub.f32 %v539_v61, %v154_v20 }
  0x91   :  { %v269_v14 = vadd.f32 %v252_v1, %v229_v60 }
  0x93   :  { %v285_v2 = vand.u32 2147483647, %v269_v14 }
  0x95   :  { %v304_v16 = vrot.slane %v285_v2, 2 }
  0x96   :  { %v244_v46 = vpop.permute.xlu1 %243  ;;  %v242_v47 = vpop.permute.xlu0 %241 }
  0x97   :  { %v265_v50 = vadd.f32 %v244_v46, %v225_v44  ;;  %v264_v51 = vadd.f32 %v242_v47, %v224_v45  ;;  %v160_v32 = vpop.permute.xlu2 %159 }
  0x99   :  { %v281_v21 = vand.u32 2147483647, %v265_v50  ;;  %v280_v52 = vand.u32 2147483647, %v264_v51  ;;  %v179_v50 = vsub.f32 %v557_v12, %v160_v32 }
  0x9b   :  { %v298_v55 = vrot.slane %v281_v21, 2  ;;  %v296_v56 = vrot.slane %v280_v52, 2  ;;  %v275_v51 = vand.u32 2147483647, %v179_v50 }
  0x9d   :  { %309 = vrot.lane.b32.xlu1 %v296_v56, %s423_s14  ;;  %v300_v10 = vsel %vm85_vm2, %v298_v55, %v299_v39  ;;  %v297_v22 = vsel %vm85_vm2, %v295_v54, %v296_v56 }
  0x9e   :  { %v250_v58 = vpop.permute.xlu1 %249  ;;  %311 = vrot.lane.b32.xlu2 %v300_v10, %s423_s14  ;;  %307 = vrot.lane.b32.xlu0 %v297_v22, %s423_s14  ;;  %v248_v59 = vpop.permute.xlu0 %247 }
  0x9f   :  { %v268_v27 = vadd.f32 %v250_v58, %v228_v53  ;;  %v267_v63 = vadd.f32 %v248_v59, %v227_v11  ;;  %v166_v25 = vpop.permute.xlu2 %165 }
  0xa0   :  { %v182_v53 = vsub.f32 %v571_v29, %v166_v25 }
  0xa1   :  { %v284_v3 = vand.u32 2147483647, %v268_v27  ;;  %v283_v5 = vand.u32 2147483647, %v267_v63 }
  0xa3   :  { %v302_v0 = vrot.slane %v284_v3, 2  ;;  %v301_v6 = vrot.slane %v283_v5, 2 }
  0xa5   :  { %v303_v9 = vsel %vm85_vm2, %v301_v6, %v302_v0 }
  0xa6   :  { %317 = vrot.lane.b32.xlu2 %v302_v0, %s423_s14  ;;  %v254_v13 = vpop.permute.xlu0 %253  ;;  %315 = vrot.lane.b32.xlu1 %v303_v9, %s423_s14  ;;  %v152_v24 = vpop.permute.xlu1 %151 }
  0xa7   :  { %v270_v15 = vadd.f32 %v254_v13, %v230_v8  ;;  %v175_v44 = vsub.f32 %v532_v57, %v152_v24  ;;  %v278_v57 = vand.u32 2147483647, %v182_v53 }
  0xa9   :  { %v286_v33 = vand.u32 2147483647, %v270_v15  ;;  %v271_v45 = vand.u32 2147483647, %v175_v44 }
  0xab   :  { %v305_v17 = vrot.slane %v286_v33, 2 }
  0xad   :  { %v306_v7 = vsel %vm85_vm2, %v304_v16, %v305_v17 }
  0xae   :  { %319 = vrot.lane.b32.xlu0 %v306_v7, %s423_s14  ;;  %321 = vrot.lane.b32.xlu1 %v305_v17, %s423_s14  ;;  %v156_v23 = vpop.permute.xlu0 %155  ;;  %v158_v34 = vpop.permute.xlu1 %157 }
  0xaf   :  { %v177_v26 = vsub.f32 %v522_v48, %v156_v23  ;;  %v178_v37 = vsub.f32 %v549_v4, %v158_v34 }
  0xb1   :  { %v273_v30 = vand.u32 2147483647, %v177_v26  ;;  %v274_v19 = vand.u32 2147483647, %v178_v37 }
  0xb6   :  { %v162_v31 = vpop.permute.xlu0 %161  ;;  %v164_v48 = vpop.permute.xlu1 %163 }
  0xb7   :  { %v180_v18 = vsub.f32 %v541_v62, %v162_v31  ;;  %v272_v62 = vand.u32 2147483647, %v176_v43  ;;  %v181_v61 = vsub.f32 %v569_v28, %v164_v48 }
  0xb9   :  { %v276_v38 = vand.u32 2147483647, %v180_v18  ;;  %v277_v54 = vand.u32 2147483647, %v181_v61 }
  0xf8   :  { %v312_v35 = vpop.permute.xlu2 %311 }
  0xf9   :  { %v333_v36 = vadd.f32 %v312_v35, %v273_v30 }
  0xfb   :  { %351 = vrot.lane.b32.xlu1 %v333_v36, %s422_s13 }
 0x100   :  { %v318_v39 = vpop.permute.xlu2 %317 }
 0x101   :  { %v336_v40 = vadd.f32 %v318_v39, %v276_v38  ;;  %v314_v41 = vpop.permute.xlu0 %313 }
 0x102   :  { %v334_v42 = vadd.f32 %v314_v41, %v274_v19 }
 0x103   :  { %357 = vrot.lane.b32.xlu1 %v336_v40, %s422_s13 }
 0x104   :  { %353 = vrot.lane.b32.xlu2 %v334_v42, %s422_s13 }
 0x10f   :  { %v310_v4 = vpop.permute.xlu1 %309 }
 0x110   :  { %v332_v46 = vadd.f32 %v310_v4, %v272_v62  ;;  %v308_v47 = vpop.permute.xlu0 %307 }
 0x111   :  { %v331_v49 = vadd.f32 %v308_v47, %v271_v45 }
 0x112   :  { %349 = vrot.lane.b32.xlu0 %v332_v46, %s422_s13 }
 0x113   :  { %347 = vrot.lane.b32.xlu2 %v331_v49, %s422_s13 }
 0x118   :  { %v316_v21 = vpop.permute.xlu1 %315 }
 0x119   :  { %v335_v52 = vadd.f32 %v316_v21, %v275_v51 }
 0x11b   :  { %355 = vrot.lane.b32.xlu0 %v335_v52, %s422_s13 }
 0x120   :  { %v320_v55 = vpop.permute.xlu0 %319  ;;  %v322_v56 = vpop.permute.xlu1 %321 }
 0x121   :  { %v337_v11 = vadd.f32 %v320_v55, %v277_v54  ;;  %v338_v10 = vadd.f32 %v322_v56, %v278_v57 }
 0x123   :  { %359 = vrot.lane.b32.xlu2 %v337_v11, %s422_s13  ;;  %361 = vrot.lane.b32.xlu0 %v338_v10, %s422_s13 }
 0x15e   :  { %v354_v12 = vpop.permute.xlu2 %353 }
 0x15f   :  { %376 = vst.msk [vmem:[%s642_s1 + $0x18] sm:$0x3f] %vm373_vm3, %v354_v12 }
 0x16d   :  { %v348_v28 = vpop.permute.xlu2 %347  ;;  %v352_v29 = vpop.permute.xlu1 %351 }
 0x16e   :  { %372 = vst.msk [vmem:[%s642_s1] sm:$0xff] %vm371_vm4, %v348_v28 }
 0x16f   :  { %375 = vst.msk [vmem:[%s642_s1 + $0x10] sm:$0xff] %vm371_vm4, %v352_v29 }
 0x175   :  { %v358_v22 = vpop.permute.xlu1 %357 }
 0x176   :  { %378 = vst.msk [vmem:[%s642_s1 + $0x28] sm:$0x3f] %vm373_vm3, %v358_v22 }
 0x17d   :  { %v360_v58 = vpop.permute.xlu2 %359 }
 0x17e   :  { %379 = vst.msk [vmem:[%s642_s1 + $0x30] sm:$0xff] %vm371_vm4, %v360_v58 }
 0x184   :  { %v350_v59 = vpop.permute.xlu0 %349 }
 0x185   :  { %374 = vst.msk [vmem:[%s642_s1 + $0x8] sm:$0x3f] %vm373_vm3, %v350_v59 }
 0x18d   :  { %v356_v60 = vpop.permute.xlu0 %355 }
 0x18e   :  { %377 = vst.msk [vmem:[%s642_s1 + $0x20] sm:$0xff] %vm371_vm4, %v356_v60 }
 0x195   :  { %v362_v27 = vpop.permute.xlu0 %361 }
 0x196   :  { %380 = vst.msk [vmem:[%s642_s1 + $0x38] sm:$0x3f] %vm373_vm3, %v362_v27 }
 0x197   :  { %385 = vsyncpa [#allocation3], 1 }

</bundles_post_ra>
